<compile_context>
chip_gen: v5e
topology: v5e:2x2
jax: 0.10.0
libtpu: 0.0.40
codegen_flags: <defaults>
</compile_context>

<pallas_src>
import functools

import jax
import jax.numpy as jnp
from jax.experimental import pallas as pl
from jax.experimental.pallas import tpu as pltpu


def _round_up(x, m):
    return ((x + m - 1) // m) * m


def _nssim_kernel(x_ref, y_ref, ssim_ref,
                  sx_ref, sy_ref, sxx_ref, syy_ref, sxy_ref,
                  *, inv_hw):
    """One grid step over a (TM, TK) tile of the [NC, HW] slab.

    grid = (row_tiles, hw_tiles); hw (k) is the reduction axis.  Scratch
    accumulators persist across k; SSIM is formed once on the last k step.
    """
    k = pl.program_id(1)

    @pl.when(k == 0)
    def _():
        sx_ref[...] = jnp.zeros_like(sx_ref)
        sy_ref[...] = jnp.zeros_like(sy_ref)
        sxx_ref[...] = jnp.zeros_like(sxx_ref)
        syy_ref[...] = jnp.zeros_like(syy_ref)
        sxy_ref[...] = jnp.zeros_like(sxy_ref)

    x = x_ref[...].astype(jnp.float32)
    y = y_ref[...].astype(jnp.float32)

    # One-pass moment accumulation (sums only in the hot loop; divide once at
    # finalize).  Spatial zero-padding contributes nothing to these sums.
    sx_ref[...] += jnp.sum(x, axis=1, keepdims=True)
    sy_ref[...] += jnp.sum(y, axis=1, keepdims=True)
    sxx_ref[...] += jnp.sum(x * x, axis=1, keepdims=True)
    syy_ref[...] += jnp.sum(y * y, axis=1, keepdims=True)
    sxy_ref[...] += jnp.sum(x * y, axis=1, keepdims=True)

    @pl.when(k == pl.num_programs(1) - 1)
    def _():
        m1 = sx_ref[...] * inv_hw
        m2 = sy_ref[...] * inv_hw
        sig1 = sxx_ref[...] * inv_hw - m1 * m1
        sig2 = syy_ref[...] * inv_hw - m2 * m2
        sig12 = sxy_ref[...] * inv_hw - m1 * m2
        t1 = 2.0 * m1 * m2 + 0.0001
        t2 = 2.0 * sig12 + 0.0009
        t3 = m1 * m1 + m2 * m2 + 0.0001
        t4 = sig1 + sig2 + 0.0009
        # Exact divide (out of the hot loop, so cost is negligible and we keep
        # full precision vs the two-pass reference).
        ssim_ref[...] = (t1 * t2) / (t3 * t4)


def _choose_tiles(nc, hw):
    # Row tile: multiple of 8 (f32 sublane), capped at 256.
    tm = min(_round_up(nc, 8), 256)
    # HW tile: large multiple of 128, capped so each input block is ~2 MiB f32.
    # 2 inputs x 2 pipeline buffers x 2 MiB = 8 MiB, safely under v5e's 16 MiB
    # scoped default and v7x's 64 MiB physical VMEM.
    max_lanes = max(128, ((2 * 1024 * 1024) // (4 * tm)) // 128 * 128)
    tk = min(_round_up(hw, 128), max_lanes, 4096)
    return tm, tk


def nssim(X, Y):
    """X, Y: [N, C, H, W] arrays. Returns loss of shape (1, 1) float32."""
    N, C, H, W = X.shape
    assert Y.shape == X.shape
    nc, hw = N * C, H * W

    x2 = X.reshape(nc, hw)
    y2 = Y.reshape(nc, hw)

    tm, tk = _choose_tiles(nc, hw)
    nc_pad = _round_up(nc, tm)
    hw_pad = _round_up(hw, tk)
    if (nc_pad, hw_pad) != (nc, hw):
        pad = ((0, nc_pad - nc), (0, hw_pad - hw))
        x2 = jnp.pad(x2, pad)
        y2 = jnp.pad(y2, pad)

    grid = (nc_pad // tm, hw_pad // tk)
    kernel = functools.partial(_nssim_kernel, inv_hw=1.0 / float(hw))

    ssim = pl.pallas_call(
        kernel,
        out_shape=jax.ShapeDtypeStruct((nc_pad, 1), jnp.float32),
        grid_spec=pltpu.PrefetchScalarGridSpec(
            num_scalar_prefetch=0,
            grid=grid,
            in_specs=[
                pl.BlockSpec((tm, tk), lambda i, k: (i, k)),
                pl.BlockSpec((tm, tk), lambda i, k: (i, k)),
            ],
            out_specs=pl.BlockSpec((tm, 1), lambda i, k: (i, 0)),
            scratch_shapes=[pltpu.VMEM((tm, 1), jnp.float32)] * 5,
        ),
        compiler_params=pltpu.CompilerParams(
            dimension_semantics=("parallel", "arbitrary"),
            vmem_limit_bytes=32 * 1024 * 1024,
        ),
    )(x2, y2)

    # Tiny final reduce in XLA.  mean over channels then batch of equal-size
    # groups == flat mean over all (n, c) rows; shape (1, 1) matches torch.
    loss = 1.0 - jnp.mean(ssim[:nc, 0])
    return loss.reshape(1, 1)


def _nssim_ref(X, Y):
    # Pure-JAX reference mirroring the PyTorch module exactly (two-pass).
    m1 = jnp.mean(X, axis=(2, 3), keepdims=True)
    m2 = jnp.mean(Y, axis=(2, 3), keepdims=True)
    sig1 = jnp.mean((X - m1) ** 2, axis=(2, 3), keepdims=True)
    sig2 = jnp.mean((Y - m2) ** 2, axis=(2, 3), keepdims=True)
    sig1_2 = jnp.mean((X - m1) * (Y - m2), axis=(2, 3), keepdims=True)
    t1 = 2 * m1 * m2 + 0.0001
    t2 = 2 * sig1_2 + 0.0009
    t3 = m1 ** 2 + m2 ** 2 + 0.0001
    t4 = sig1 + sig2 + 0.0009
    ssim = (t1 * t2) / (t3 * t4)
    temp = jnp.mean(ssim, axis=1)
    return jnp.mean(1.0 - temp, axis=0)


if __name__ == "__main__":
    key = jax.random.PRNGKey(0)
    kx, ky = jax.random.split(key)

    # Aligned shapes.
    N, C, H, W = 2, 4, 16, 16
    X = jax.random.uniform(kx, (N, C, H, W), dtype=jnp.float32)
    Y = jax.random.uniform(ky, (N, C, H, W), dtype=jnp.float32)

    loss = nssim(X, Y)
    jax.block_until_ready(loss)

    ref = _nssim_ref(X, Y)
    assert loss.shape == (1, 1), loss.shape
    assert jnp.allclose(loss, ref, atol=1e-4, rtol=1e-4), (loss, ref)

    # Non-aligned shapes (exercises row/lane padding path).
    k2x, k2y = jax.random.split(jax.random.PRNGKey(0), 2)
    X2 = jax.random.uniform(k2x, (2, 3, 10, 13), dtype=jnp.float32)
    Y2 = jax.random.uniform(k2y, (2, 3, 10, 13), dtype=jnp.float32)
    loss2 = nssim(X2, Y2)
    jax.block_until_ready(loss2)
    ref2 = _nssim_ref(X2, Y2)
    assert jnp.allclose(loss2, ref2, atol=1e-4, rtol=1e-4), (loss2, ref2)

    print("KERNEL_OK")
</pallas_src>

<mosaic_0001>
module attributes {stable_mosaic.version = 11 : i64} {
  func.func @_nssim_kernel(%arg0: i32, %arg1: i32, %arg2: memref<8x256xf32, #tpu.memory_space<vmem>>, %arg3: memref<8x256xf32, #tpu.memory_space<vmem>>, %arg4: memref<8x1xf32, #tpu.memory_space<vmem>>, %arg5: memref<8x1xf32, #tpu.memory_space<vmem>>, %arg6: memref<8x1xf32, #tpu.memory_space<vmem>>, %arg7: memref<8x1xf32, #tpu.memory_space<vmem>>, %arg8: memref<8x1xf32, #tpu.memory_space<vmem>>, %arg9: memref<8x1xf32, #tpu.memory_space<vmem>>) attributes {dimension_semantics = [#tpu.dimension_semantics<parallel>, #tpu.dimension_semantics<arbitrary>], iteration_bounds = array<i64: 1, 1>, scalar_prefetch = 0 : i64, scratch_operands = 5 : i64, tpu.core_type = #tpu.core_type<tc>, window_params = [{transform_indices = @transform_0, window_bounds = array<i64: 8, 256>}, {transform_indices = @transform_1, window_bounds = array<i64: 8, 256>}, {transform_indices = @transform_2, window_bounds = array<i64: 8, 1>}]} {
    %c0_i32 = arith.constant 0 : i32
    %0 = arith.cmpi eq, %arg1, %c0_i32 : i32
    %1 = arith.extui %0 : i1 to i32
    %c0_i32_0 = arith.constant 0 : i32
    %2 = arith.cmpi ne, %1, %c0_i32_0 : i32
    scf.if %2 {
      %cst_30 = arith.constant 0.000000e+00 : f32
      %36 = vector.broadcast %cst_30 : f32 to vector<8x1xf32>
      %c0_31 = arith.constant 0 : index
      %c0_32 = arith.constant 0 : index
      %37 = vector.load %arg5[%c0_31, %c0_32] : memref<8x1xf32, #tpu.memory_space<vmem>>, vector<8x1xf32>
      tpu.vector_store %arg5[%c0_31, %c0_32], %36 {strides = array<i32>} : memref<8x1xf32, #tpu.memory_space<vmem>>, vector<8x1xf32>,
      %cst_33 = arith.constant 0.000000e+00 : f32
      %38 = vector.broadcast %cst_33 : f32 to vector<8x1xf32>
      %c0_34 = arith.constant 0 : index
      %c0_35 = arith.constant 0 : index
      %39 = vector.load %arg6[%c0_34, %c0_35] : memref<8x1xf32, #tpu.memory_space<vmem>>, vector<8x1xf32>
      tpu.vector_store %arg6[%c0_34, %c0_35], %38 {strides = array<i32>} : memref<8x1xf32, #tpu.memory_space<vmem>>, vector<8x1xf32>,
      %cst_36 = arith.constant 0.000000e+00 : f32
      %40 = vector.broadcast %cst_36 : f32 to vector<8x1xf32>
      %c0_37 = arith.constant 0 : index
      %c0_38 = arith.constant 0 : index
      %41 = vector.load %arg7[%c0_37, %c0_38] : memref<8x1xf32, #tpu.memory_space<vmem>>, vector<8x1xf32>
      tpu.vector_store %arg7[%c0_37, %c0_38], %40 {strides = array<i32>} : memref<8x1xf32, #tpu.memory_space<vmem>>, vector<8x1xf32>,
      %cst_39 = arith.constant 0.000000e+00 : f32
      %42 = vector.broadcast %cst_39 : f32 to vector<8x1xf32>
      %c0_40 = arith.constant 0 : index
      %c0_41 = arith.constant 0 : index
      %43 = vector.load %arg8[%c0_40, %c0_41] : memref<8x1xf32, #tpu.memory_space<vmem>>, vector<8x1xf32>
      tpu.vector_store %arg8[%c0_40, %c0_41], %42 {strides = array<i32>} : memref<8x1xf32, #tpu.memory_space<vmem>>, vector<8x1xf32>,
      %cst_42 = arith.constant 0.000000e+00 : f32
      %44 = vector.broadcast %cst_42 : f32 to vector<8x1xf32>
      %c0_43 = arith.constant 0 : index
      %c0_44 = arith.constant 0 : index
      %45 = vector.load %arg9[%c0_43, %c0_44] : memref<8x1xf32, #tpu.memory_space<vmem>>, vector<8x1xf32>
      tpu.vector_store %arg9[%c0_43, %c0_44], %44 {strides = array<i32>} : memref<8x1xf32, #tpu.memory_space<vmem>>, vector<8x1xf32>,
    } else {
    }
    %c0 = arith.constant 0 : index
    %c0_1 = arith.constant 0 : index
    %3 = vector.load %arg2[%c0, %c0_1] : memref<8x256xf32, #tpu.memory_space<vmem>>, vector<8x256xf32>
    %c0_2 = arith.constant 0 : index
    %c0_3 = arith.constant 0 : index
    %4 = vector.load %arg3[%c0_2, %c0_3] : memref<8x256xf32, #tpu.memory_space<vmem>>, vector<8x256xf32>
    %c0_4 = arith.constant 0 : index
    %c0_5 = arith.constant 0 : index
    %5 = vector.load %arg5[%c0_4, %c0_5] : memref<8x1xf32, #tpu.memory_space<vmem>>, vector<8x1xf32>
    %cst = arith.constant dense<0.000000e+00> : vector<8xf32>
    %6 = vector.multi_reduction <add>, %3, %cst [1] : vector<8x256xf32> to vector<8xf32>
    %7 = vector.shape_cast %6 : vector<8xf32> to vector<8x1xf32>
    %8 = arith.addf %5, %7 : vector<8x1xf32>
    %c0_6 = arith.constant 0 : index
    %c0_7 = arith.constant 0 : index
    %9 = vector.load %arg5[%c0_6, %c0_7] : memref<8x1xf32, #tpu.memory_space<vmem>>, vector<8x1xf32>
    tpu.vector_store %arg5[%c0_6, %c0_7], %8 {strides = array<i32>} : memref<8x1xf32, #tpu.memory_space<vmem>>, vector<8x1xf32>,
    %c0_8 = arith.constant 0 : index
    %c0_9 = arith.constant 0 : index
    %10 = vector.load %arg6[%c0_8, %c0_9] : memref<8x1xf32, #tpu.memory_space<vmem>>, vector<8x1xf32>
    %cst_10 = arith.constant dense<0.000000e+00> : vector<8xf32>
    %11 = vector.multi_reduction <add>, %4, %cst_10 [1] : vector<8x256xf32> to vector<8xf32>
    %12 = vector.shape_cast %11 : vector<8xf32> to vector<8x1xf32>
    %13 = arith.addf %10, %12 : vector<8x1xf32>
    %c0_11 = arith.constant 0 : index
    %c0_12 = arith.constant 0 : index
    %14 = vector.load %arg6[%c0_11, %c0_12] : memref<8x1xf32, #tpu.memory_space<vmem>>, vector<8x1xf32>
    tpu.vector_store %arg6[%c0_11, %c0_12], %13 {strides = array<i32>} : memref<8x1xf32, #tpu.memory_space<vmem>>, vector<8x1xf32>,
    %c0_13 = arith.constant 0 : index
    %c0_14 = arith.constant 0 : index
    %15 = vector.load %arg7[%c0_13, %c0_14] : memref<8x1xf32, #tpu.memory_space<vmem>>, vector<8x1xf32>
    %16 = arith.mulf %3, %3 : vector<8x256xf32>
    %cst_15 = arith.constant dense<0.000000e+00> : vector<8xf32>
    %17 = vector.multi_reduction <add>, %16, %cst_15 [1] : vector<8x256xf32> to vector<8xf32>
    %18 = vector.shape_cast %17 : vector<8xf32> to vector<8x1xf32>
    %19 = arith.addf %15, %18 : vector<8x1xf32>
    %c0_16 = arith.constant 0 : index
    %c0_17 = arith.constant 0 : index
    %20 = vector.load %arg7[%c0_16, %c0_17] : memref<8x1xf32, #tpu.memory_space<vmem>>, vector<8x1xf32>
    tpu.vector_store %arg7[%c0_16, %c0_17], %19 {strides = array<i32>} : memref<8x1xf32, #tpu.memory_space<vmem>>, vector<8x1xf32>,
    %c0_18 = arith.constant 0 : index
    %c0_19 = arith.constant 0 : index
    %21 = vector.load %arg8[%c0_18, %c0_19] : memref<8x1xf32, #tpu.memory_space<vmem>>, vector<8x1xf32>
    %22 = arith.mulf %4, %4 : vector<8x256xf32>
    %cst_20 = arith.constant dense<0.000000e+00> : vector<8xf32>
    %23 = vector.multi_reduction <add>, %22, %cst_20 [1] : vector<8x256xf32> to vector<8xf32>
    %24 = vector.shape_cast %23 : vector<8xf32> to vector<8x1xf32>
    %25 = arith.addf %21, %24 : vector<8x1xf32>
    %c0_21 = arith.constant 0 : index
    %c0_22 = arith.constant 0 : index
    %26 = vector.load %arg8[%c0_21, %c0_22] : memref<8x1xf32, #tpu.memory_space<vmem>>, vector<8x1xf32>
    tpu.vector_store %arg8[%c0_21, %c0_22], %25 {strides = array<i32>} : memref<8x1xf32, #tpu.memory_space<vmem>>, vector<8x1xf32>,
    %c0_23 = arith.constant 0 : index
    %c0_24 = arith.constant 0 : index
    %27 = vector.load %arg9[%c0_23, %c0_24] : memref<8x1xf32, #tpu.memory_space<vmem>>, vector<8x1xf32>
    %28 = arith.mulf %3, %4 : vector<8x256xf32>
    %cst_25 = arith.constant dense<0.000000e+00> : vector<8xf32>
    %29 = vector.multi_reduction <add>, %28, %cst_25 [1] : vector<8x256xf32> to vector<8xf32>
    %30 = vector.shape_cast %29 : vector<8xf32> to vector<8x1xf32>
    %31 = arith.addf %27, %30 : vector<8x1xf32>
    %c0_26 = arith.constant 0 : index
    %c0_27 = arith.constant 0 : index
    %32 = vector.load %arg9[%c0_26, %c0_27] : memref<8x1xf32, #tpu.memory_space<vmem>>, vector<8x1xf32>
    tpu.vector_store %arg9[%c0_26, %c0_27], %31 {strides = array<i32>} : memref<8x1xf32, #tpu.memory_space<vmem>>, vector<8x1xf32>,
    %c0_i32_28 = arith.constant 0 : i32
    %33 = arith.cmpi eq, %arg1, %c0_i32_28 : i32
    %34 = arith.extui %33 : i1 to i32
    %c0_i32_29 = arith.constant 0 : i32
    %35 = arith.cmpi ne, %34, %c0_i32_29 : i32
    scf.if %35 {
      %c0_30 = arith.constant 0 : index
      %c0_31 = arith.constant 0 : index
      %36 = vector.load %arg5[%c0_30, %c0_31] : memref<8x1xf32, #tpu.memory_space<vmem>>, vector<8x1xf32>
      %cst_32 = arith.constant 3.906250e-03 : f32
      %37 = vector.broadcast %cst_32 : f32 to vector<8x1xf32>
      %38 = arith.mulf %36, %37 : vector<8x1xf32>
      %c0_33 = arith.constant 0 : index
      %c0_34 = arith.constant 0 : index
      %39 = vector.load %arg6[%c0_33, %c0_34] : memref<8x1xf32, #tpu.memory_space<vmem>>, vector<8x1xf32>
      %cst_35 = arith.constant 3.906250e-03 : f32
      %40 = vector.broadcast %cst_35 : f32 to vector<8x1xf32>
      %41 = arith.mulf %39, %40 : vector<8x1xf32>
      %c0_36 = arith.constant 0 : index
      %c0_37 = arith.constant 0 : index
      %42 = vector.load %arg7[%c0_36, %c0_37] : memref<8x1xf32, #tpu.memory_space<vmem>>, vector<8x1xf32>
      %cst_38 = arith.constant 3.906250e-03 : f32
      %43 = vector.broadcast %cst_38 : f32 to vector<8x1xf32>
      %44 = arith.mulf %42, %43 : vector<8x1xf32>
      %45 = arith.mulf %38, %38 : vector<8x1xf32>
      %46 = arith.subf %44, %45 : vector<8x1xf32>
      %c0_39 = arith.constant 0 : index
      %c0_40 = arith.constant 0 : index
      %47 = vector.load %arg8[%c0_39, %c0_40] : memref<8x1xf32, #tpu.memory_space<vmem>>, vector<8x1xf32>
      %cst_41 = arith.constant 3.906250e-03 : f32
      %48 = vector.broadcast %cst_41 : f32 to vector<8x1xf32>
      %49 = arith.mulf %47, %48 : vector<8x1xf32>
      %50 = arith.mulf %41, %41 : vector<8x1xf32>
      %51 = arith.subf %49, %50 : vector<8x1xf32>
      %c0_42 = arith.constant 0 : index
      %c0_43 = arith.constant 0 : index
      %52 = vector.load %arg9[%c0_42, %c0_43] : memref<8x1xf32, #tpu.memory_space<vmem>>, vector<8x1xf32>
      %cst_44 = arith.constant 3.906250e-03 : f32
      %53 = vector.broadcast %cst_44 : f32 to vector<8x1xf32>
      %54 = arith.mulf %52, %53 : vector<8x1xf32>
      %55 = arith.mulf %38, %41 : vector<8x1xf32>
      %56 = arith.subf %54, %55 : vector<8x1xf32>
      %cst_45 = arith.constant 2.000000e+00 : f32
      %57 = vector.broadcast %cst_45 : f32 to vector<8x1xf32>
      %58 = arith.mulf %57, %38 : vector<8x1xf32>
      %59 = arith.mulf %58, %41 : vector<8x1xf32>
      %cst_46 = arith.constant 9.99999974E-5 : f32
      %60 = vector.broadcast %cst_46 : f32 to vector<8x1xf32>
      %61 = arith.addf %59, %60 : vector<8x1xf32>
      %cst_47 = arith.constant 2.000000e+00 : f32
      %62 = vector.broadcast %cst_47 : f32 to vector<8x1xf32>
      %63 = arith.mulf %62, %56 : vector<8x1xf32>
      %cst_48 = arith.constant 8.99999984E-4 : f32
      %64 = vector.broadcast %cst_48 : f32 to vector<8x1xf32>
      %65 = arith.addf %63, %64 : vector<8x1xf32>
      %66 = arith.mulf %38, %38 : vector<8x1xf32>
      %67 = arith.mulf %41, %41 : vector<8x1xf32>
      %68 = arith.addf %66, %67 : vector<8x1xf32>
      %cst_49 = arith.constant 9.99999974E-5 : f32
      %69 = vector.broadcast %cst_49 : f32 to vector<8x1xf32>
      %70 = arith.addf %68, %69 : vector<8x1xf32>
      %71 = arith.addf %46, %51 : vector<8x1xf32>
      %cst_50 = arith.constant 8.99999984E-4 : f32
      %72 = vector.broadcast %cst_50 : f32 to vector<8x1xf32>
      %73 = arith.addf %71, %72 : vector<8x1xf32>
      %74 = arith.mulf %61, %65 : vector<8x1xf32>
      %75 = arith.mulf %70, %73 : vector<8x1xf32>
      %76 = arith.divf %74, %75 : vector<8x1xf32>
      %c0_51 = arith.constant 0 : index
      %c0_52 = arith.constant 0 : index
      %77 = vector.load %arg4[%c0_51, %c0_52] : memref<8x1xf32, #tpu.memory_space<vmem>>, vector<8x1xf32>
      tpu.vector_store %arg4[%c0_51, %c0_52], %76 {strides = array<i32>} : memref<8x1xf32, #tpu.memory_space<vmem>>, vector<8x1xf32>,
    } else {
    }
    return
  }
  func.func @transform_0(%arg0: i32, %arg1: i32) -> (i32, i32) {
    %c0_i32 = arith.constant 0 : i32
    return %arg0, %arg1 : i32, i32
  }
  func.func @transform_1(%arg0: i32, %arg1: i32) -> (i32, i32) {
    %c0_i32 = arith.constant 0 : i32
    return %arg0, %arg1 : i32, i32
  }
  func.func @transform_2(%arg0: i32, %arg1: i32) -> (i32, i32) {
    %c0_i32 = arith.constant 0 : i32
    %c0_i32_0 = arith.constant 0 : i32
    return %arg0, %c0_i32 : i32, i32
  }
}

</mosaic_0001>

<bundles_post_ra>
// kernel: tpu_custom_call.1
= control target key start
LH: loop header
LB: loop body
LE: loop exit
PB: predicated region body
PF: predicated region fallthrough
CT: control target
= control target key end

     0   :  { %7 = vsyncpa [#allocation8], 0  ;;  %s237_s0 = inlined_call_operand.hbm [shape: f32[8,256], index: 0, kind: input, shape index: {}]   ;;  %s238_s1 = inlined_call_operand.hbm [shape: f32[8,256], index: 1, kind: input, shape index: {}]   ;;  %s239_s2 = inlined_call_operand.vmem [shape: f32[8,1], index: 2, kind: output, shape index: {}]  }
   0x1   :  { %s14_s11 = sshll.u32 %s237_s0, 4  ;;  %s15_s11 = int_to_ptr.hbm [resolvable:$true] %s14_s11 }
   0x2   :  { %8 = vsyncpa [#allocation10], 0  ;;  %s199_s12 = smov [#allocation7]   ;;  %s25_s16 = sshll.u32 %s238_s1, 4  ;;  %s26_s16 = int_to_ptr.hbm [resolvable:$true] %s25_s16 }
   0x3   :  { %s16_s13 = sshll.u32 %s199_s12, 4  ;;  %s200_s17 = smov [#allocation9]   ;;  %s17_s13 = int_to_ptr.vmem [resolvable:$true] %s16_s13 }
   0x4   :  { %19 = dma.hbm_to_vmem [thread:$0]  %s15_s11, 256, %s17_s13, [#allocation8]  }
   0x5   :  { %s27_s18 = sshll.u32 %s200_s17, 4  ;;  %s28_s18 = int_to_ptr.vmem [resolvable:$true] %s27_s18 }
   0x6   :  { %30 = dma.hbm_to_vmem [thread:$0]  %s26_s16, 256, %s28_s18, [#allocation10]  }
   0x7   :  { %195 = dma.done.wait [#allocation8], 256  }
   0x8   :  { %196 = vsyncadd [#allocation8], 4294967040 }
   0x9   :  { %197 = dma.done.wait [#allocation10], 256  }
   0xa   :  { %198 = vsyncadd [#allocation10], 4294967040  ;;  %vm43_vm0 = vcmask 7168   ;;  %v201_v0 = vmov 0.0   ;;  %v49_v1 = vld [vmem:[#allocation7] sm:$0xff]  ;;  %v50_v2 = vld [vmem:[#allocation7 + $0x8] sm:$0xff] }
   0xb   :  { %44 = vst.msk [vmem:[#allocation2] sm:$0xff] %vm43_vm0, %v201_v0  ;;  %v51_v3 = vld [vmem:[#allocation9] sm:$0xff]  ;;  %v54_v4 = vadd.f32 %v50_v2, %v49_v1  ;;  %v67_v5 = vmul.f32 %v49_v1, %v49_v1  ;;  %v68_v6 = vmul.f32 %v50_v2, %v50_v2  ;;  %v52_v7 = vld [vmem:[#allocation9 + $0x8] sm:$0xff] }
   0xc   :  { %45 = vst.msk [vmem:[#allocation3] sm:$0xff] %vm43_vm0, %v201_v0  ;;  %v83_v8 = vmul.f32 %v51_v3, %v49_v1  ;;  %v84_v9 = vmul.f32 %v52_v7, %v50_v2  ;;  %v75_v12 = vmul.f32 %v51_v3, %v51_v3  ;;  %v76_v13 = vmul.f32 %v52_v7, %v52_v7 }
   0xd   :  { %46 = vst.msk [vmem:[#allocation4] sm:$0xff] %vm43_vm0, %v201_v0  ;;  %55 = vadd.xlane.f32.xlu0 %v54_v4  ;;  %v69_v10 = vadd.f32 %v68_v6, %v67_v5  ;;  %v61_v14 = vadd.f32 %v52_v7, %v51_v3 }
   0xe   :  { %47 = vst.msk [vmem:[#allocation5] sm:$0xff] %vm43_vm0, %v201_v0  ;;  %v85_v11 = vadd.f32 %v84_v9, %v83_v8  ;;  %v77_v15 = vadd.f32 %v76_v13, %v75_v12 }
   0xf   :  { %48 = vst.msk [vmem:[#allocation6] sm:$0xff] %vm43_vm0, %v201_v0  ;;  %70 = vadd.xlane.f32.xlu1 %v69_v10 }
  0x10   :  { %86 = vadd.xlane.f32.xlu2 %v85_v11 }
  0x12   :  { %v53_v16 = vld [vmem:[#allocation2] sm:$0xff] }
  0x13   :  { %v60_v25 = vld [vmem:[#allocation3] sm:$0xff] }
  0x14   :  { %v66_v18 = vld [vmem:[#allocation4] sm:$0xff] }
  0x15   :  { %62 = vadd.xlane.f32.xlu0 %v61_v14  ;;  %v74_v27 = vld [vmem:[#allocation5] sm:$0xff] }
  0x16   :  { %v82_v20 = vld [vmem:[#allocation6] sm:$0xff] }
  0x17   :  { %78 = vadd.xlane.f32.xlu1 %v77_v15 }
  0x80   :  { %v56_v17 = vpop.xlane.xlu0 %55 }
  0x81   :  { %v57_v19 = vadd.f32 %v56_v17, %v53_v16 }
  0x82   :  { %v71_v21 = vpop.xlane.xlu1 %70 }
  0x83   :  { %59 = vst.msk [vmem:[#allocation2] sm:$0xff] %vm43_vm0, %v57_v19  ;;  %v72_v22 = vadd.f32 %v71_v21, %v66_v18  ;;  %v87_v23 = vpop.xlane.xlu2 %86 }
  0x84   :  { %v88_v24 = vadd.f32 %v87_v23, %v82_v20 }
  0x85   :  { %73 = vst.msk [vmem:[#allocation4] sm:$0xff] %vm43_vm0, %v72_v22 }
  0x86   :  { %89 = vst.msk [vmem:[#allocation6] sm:$0xff] %vm43_vm0, %v88_v24 }
  0x88   :  { %v63_v26 = vpop.xlane.xlu0 %62 }
  0x89   :  { %v64_v28 = vadd.f32 %v63_v26, %v60_v25 }
  0x8a   :  { %v79_v29 = vpop.xlane.xlu1 %78  ;;  %v93_v31 = vld [vmem:[#allocation2] sm:$0xff] }
  0x8b   :  { %65 = vst.msk [vmem:[#allocation3] sm:$0xff] %vm43_vm0, %v64_v28  ;;  %v80_v30 = vadd.f32 %v79_v29, %v74_v27  ;;  %v94_v32 = vmul.f32 0.00390625, %v93_v31 }
  0x8c   :  { %v97_v33 = vld [vmem:[#allocation4] sm:$0xff] }
  0x8d   :  { %81 = vst.msk [vmem:[#allocation5] sm:$0xff] %vm43_vm0, %v80_v30  ;;  %v98_v35 = vmul.f32 0.00390625, %v97_v33  ;;  %v99_v36 = vmul.f32 %v94_v32, %v94_v32  ;;  %v105_v45 = vld [vmem:[#allocation6] sm:$0xff]  ;;  %v109_v53 = vmul.f32 2.0, %v94_v32 }
  0x8e   :  { %v106_v49 = vmul.f32 0.00390625, %v105_v45 }
  0x8f   :  { %v100_v41 = vsub.f32 %v98_v35, %v99_v36 }
  0x92   :  { %v95_v34 = vld [vmem:[#allocation3] sm:$0xff] }
  0x93   :  { %v96_v37 = vmul.f32 0.00390625, %v95_v34 }
  0x94   :  { %v101_v38 = vld [vmem:[#allocation5] sm:$0xff] }
  0x95   :  { %v102_v39 = vmul.f32 0.00390625, %v101_v38  ;;  %v103_v40 = vmul.f32 %v96_v37, %v96_v37  ;;  %v107_v50 = vmul.f32 %v96_v37, %v94_v32  ;;  %v110_v56 = vmul.f32 %v109_v53, %v96_v37 }
  0x97   :  { %v104_v42 = vsub.f32 %v102_v39, %v103_v40  ;;  %v114_v43 = vadd.f32 %v103_v40, %v99_v36  ;;  %v108_v51 = vsub.f32 %v106_v49, %v107_v50  ;;  %v111_v62 = vadd.f32 0.0001, %v110_v56 }
  0x99   :  { %v116_v44 = vadd.f32 %v104_v42, %v100_v41  ;;  %v115_v46 = vadd.f32 0.0001, %v114_v43  ;;  %v112_v54 = vmul.f32 2.0, %v108_v51 }
  0x9b   :  { %v117_v47 = vadd.f32 0.0009, %v116_v44  ;;  %v113_v59 = vadd.f32 0.0009, %v112_v54 }
  0x9d   :  { %v119_v48 = vmul.f32 %v117_v47, %v115_v46  ;;  %v118_v1 = vmul.f32 %v113_v59, %v111_v62 }
  0x9f   :  { %145 = vrcp.f32 %v119_v48  ;;  %v131_v58 = vand.u32 2147483648, %v119_v48  ;;  %v129_v61 = vand.u32 2147483647, %v119_v48  ;;  %vm125_vm2 = vweird.f32 %v119_v48 }
  0xa1   :  { %v132_v0 = vor.u32 1.1754944e-38, %v131_v58  ;;  %vm130_vm4 = vcmp.eq.f32.partialorder %v129_v61, 8.507059e+37 }
  0xa5   :  { %v146_v52 = vpop.eup %145 }
  0xa6   :  { %v121_v55 = vmul.f32 %v146_v52, %v119_v48  ;;  %vm126_vm1 = vweird.f32 %v146_v52 }
  0xa7   :  { %vm127_vm3 = vmor %vm125_vm2, %vm126_vm1 }
  0xa8   :  { %v122_v57 = vsub.f32 1.0, %v121_v55 }
  0xaa   :  { %v123_v60 = vmul.f32 %v146_v52, %v122_v57 }
  0xac   :  { %v124_v63 = vadd.f32 %v146_v52, %v123_v60 }
  0xae   :  { %v128_v2 = vsel %vm127_vm3, %v146_v52, %v124_v63 }
  0xaf   :  { %v133_v3 = vsel %vm130_vm4, %v132_v0, %v128_v2 }
  0xb0   :  { %v134_v4 = vmul.f32 %v133_v3, %v118_v1 }
  0xb2   :  { %135 = vst.msk [vmem:[%s239_s2] sm:$0xff] %vm43_vm0, %v134_v4 }
  0xb3   :  { %140 = vsyncpa [#allocation8], 1 }
  0xb4   :  { %141 = vsyncpa [#allocation10], 1 }

</bundles_post_ra>
